<compile_context>
chip_gen: v6e
topology: v6e:2x2x1
jax: 0.10.0
libtpu: 0.0.40
codegen_flags: <defaults>
</compile_context>

<pallas_src>
import functools

import jax
import jax.numpy as jnp
from jax import lax
from jax.experimental import pallas as pl
from jax.experimental.pallas import tpu as pltpu

ALPHA = 0.25
GAMMA = 2  # integer exponent; applied as an explicit multiply (w * w)

_LANES = 128


def _focal_loss_kernel(logits_ref, targets_ref, out_ref, *, n_rows, tile_n):
    i = pl.program_id(0)

    logits = logits_ref[...].astype(jnp.float32)   # (TN, C), f32 math in-kernel
    targets = targets_ref[...]                     # (TN, 1) int32
    tn, c = logits.shape

    # --- numerically-stable softmax pieces (single exp over the tile) ---
    m = jnp.max(logits, axis=-1, keepdims=True)                 # (TN, 1)
    shifted = logits - m                                        # (TN, C)
    e = jnp.exp(shifted)                                        # (TN, C) EUP, reused
    sumexp = jnp.sum(e, axis=-1, keepdims=True)                 # (TN, 1)

    # --- target "gather" via select (no bool->f32 cast, no extra multiply) ---
    class_ids = lax.broadcasted_iota(jnp.int32, (tn, c), dimension=1)
    is_tgt = class_ids == targets                                # (TN, C)
    tgt_shifted = jnp.sum(jnp.where(is_tgt, shifted, 0.0), axis=-1, keepdims=True)
    e_tgt = jnp.sum(jnp.where(is_tgt, e, 0.0), axis=-1, keepdims=True)

    # --- cross entropy + focal weight ---
    ce = jnp.log(sumexp) - tgt_shifted                           # (TN, 1)
    probs = e_tgt / sumexp                                       # == exp(-ce), reuses e
    w = 1.0 - probs
    focal = ALPHA * w * w * ce                                   # gamma=2, VPU only

    # --- mask ragged rows of the last tile ---
    row_ids = i * tile_n + lax.broadcasted_iota(jnp.int32, (tn, 1), dimension=0)
    focal = jnp.where(row_ids < n_rows, focal, 0.0)

    # --- lane-dense partial-sum output block (1, 1, 128) ---
    out_ref[...] = jnp.full(out_ref.shape, jnp.sum(focal), dtype=jnp.float32)


def _pick_tile_n(n, c, itemsize):
    """Largest row tile such that a double-buffered logits tile stays small."""
    per_row_bytes = max(1, c) * itemsize
    budget = 8 << 20                      # ~8 MiB per in-flight logits tile
    tn = int(max(8, min(1024, budget // per_row_bytes)))
    tn -= tn % 8                          # keep sublane dim a multiple of 8
    tn = max(tn, 8)
    if n <= tn:
        return n                          # single full-extent tile (always legal)
    return tn


def focal_loss(logits, targets, *, tile_n=None):
    """logits: (N, C) float (f32 or bf16); targets: (N,) int. Returns scalar f32."""
    n, c = logits.shape
    itemsize = jnp.dtype(logits.dtype).itemsize
    tn = tile_n if tile_n is not None else _pick_tile_n(n, c, itemsize)
    num_tiles = pl.cdiv(n, tn)

    targets2d = targets.astype(jnp.int32).reshape(n, 1)
    kernel = functools.partial(_focal_loss_kernel, n_rows=n, tile_n=tn)

    cost = pl.CostEstimate(
        flops=8 * n * c,
        transcendentals=n * c + n,
        bytes_accessed=n * c * itemsize + n * 4 + num_tiles * _LANES * 4,
    )

    partials = pl.pallas_call(
        kernel,
        out_shape=jax.ShapeDtypeStruct((num_tiles, 1, _LANES), jnp.float32),
        grid=(num_tiles,),
        in_specs=[
            pl.BlockSpec((tn, c), lambda i: (i, 0)),
            pl.BlockSpec((tn, 1), lambda i: (i, 0)),
        ],
        out_specs=pl.BlockSpec((1, 1, _LANES), lambda i: (i, 0, 0)),
        compiler_params=pltpu.CompilerParams(
            dimension_semantics=("parallel",),
            vmem_limit_bytes=32 * 1024 * 1024,
        ),
        cost_estimate=cost,
    )(logits, targets2d)

    # Tiny finalize: sum per-tile partials (all 128 lanes hold the same value,
    # take lane 0) and divide by the true N once.
    return jnp.sum(partials[:, 0, 0]) / jnp.float32(n)


def focal_loss_ref(logits, targets):
    """Pure-JAX reference mirroring the PyTorch module."""
    logits = logits.astype(jnp.float32)
    logp = jax.nn.log_softmax(logits, axis=-1)
    ce = -jnp.take_along_axis(logp, targets[:, None].astype(jnp.int32), axis=-1)[:, 0]
    probs = jnp.exp(-ce)
    focal = ALPHA * (1.0 - probs) ** GAMMA * ce
    return jnp.mean(focal)


if __name__ == "__main__":
    key = jax.random.PRNGKey(0)
    k1, k2, k3, k4 = jax.random.split(key, 4)

    # Test 1: small batch, single full-extent tile.
    N, C = 8, 16
    logits = jax.random.normal(k1, (N, C), dtype=jnp.float32)
    targets = jax.random.randint(k2, (N,), 0, C, dtype=jnp.int32)
    loss = focal_loss(logits, targets)
    jax.block_until_ready(loss)
    ref = focal_loss_ref(logits, targets)
    assert jnp.allclose(loss, ref, rtol=1e-5, atol=1e-6), (loss, ref)

    # Test 2: multi-tile grid with a ragged last tile (exercises masking + mean).
    N2, C2 = 37, 16
    logits2 = jax.random.normal(k3, (N2, C2), dtype=jnp.float32)
    targets2 = jax.random.randint(k4, (N2,), 0, C2, dtype=jnp.int32)
    loss2 = focal_loss(logits2, targets2, tile_n=16)
    jax.block_until_ready(loss2)
    ref2 = focal_loss_ref(logits2, targets2)
    assert jnp.allclose(loss2, ref2, rtol=1e-5, atol=1e-6), (loss2, ref2)

    print("KERNEL_OK")
</pallas_src>

<mosaic_0001>
module attributes {stable_mosaic.version = 11 : i64} {
  func.func @_focal_loss_kernel(%arg0: i32, %arg1: memref<8x16xf32, #tpu.memory_space<vmem>>, %arg2: memref<8x1xi32, #tpu.memory_space<vmem>>, %arg3: memref<1x1x128xf32, #tpu.memory_space<vmem>>) attributes {dimension_semantics = [#tpu.dimension_semantics<parallel>], iteration_bounds = array<i64: 1>, scalar_prefetch = 0 : i64, scratch_operands = 0 : i64, tpu.core_type = #tpu.core_type<tc>, window_params = [{transform_indices = @transform_0, window_bounds = array<i64: 8, 16>}, {transform_indices = @transform_1, window_bounds = array<i64: 8, 1>}, {transform_indices = @transform_2, window_bounds = array<i64: 1, 1, 128>}]} {
    %c0 = arith.constant 0 : index
    %c0_0 = arith.constant 0 : index
    %0 = vector.load %arg1[%c0, %c0_0] : memref<8x16xf32, #tpu.memory_space<vmem>>, vector<8x16xf32>
    %c0_1 = arith.constant 0 : index
    %c0_2 = arith.constant 0 : index
    %1 = vector.load %arg2[%c0_1, %c0_2] : memref<8x1xi32, #tpu.memory_space<vmem>>, vector<8x1xi32>
    %cst = arith.constant dense<0xFF800000> : vector<8xf32>
    %2 = vector.multi_reduction <maximumf>, %0, %cst [1] : vector<8x16xf32> to vector<8xf32>
    %3 = vector.shape_cast %2 : vector<8xf32> to vector<8x1xf32>
    %4 = vector.broadcast %3 : vector<8x1xf32> to vector<8x16xf32>
    %5 = arith.subf %0, %4 : vector<8x16xf32>
    %6 = math.exp %5 : vector<8x16xf32>
    %cst_3 = arith.constant dense<0.000000e+00> : vector<8xf32>
    %7 = vector.multi_reduction <add>, %6, %cst_3 [1] : vector<8x16xf32> to vector<8xf32>
    %8 = vector.shape_cast %7 : vector<8xf32> to vector<8x1xf32>
    %9 = tpu.iota {dimensions = array<i32: 1>} : vector<8x16xi32>
    %10 = vector.broadcast %1 : vector<8x1xi32> to vector<8x16xi32>
    %11 = arith.cmpi eq, %9, %10 : vector<8x16xi32>
    %cst_4 = arith.constant 0.000000e+00 : f32
    %12 = vector.broadcast %cst_4 : f32 to vector<8x16xf32>
    %13 = arith.select %11, %5, %12 : vector<8x16xi1>, vector<8x16xf32>
    %cst_5 = arith.constant dense<0.000000e+00> : vector<8xf32>
    %14 = vector.multi_reduction <add>, %13, %cst_5 [1] : vector<8x16xf32> to vector<8xf32>
    %15 = vector.shape_cast %14 : vector<8xf32> to vector<8x1xf32>
    %cst_6 = arith.constant 0.000000e+00 : f32
    %16 = vector.broadcast %cst_6 : f32 to vector<8x16xf32>
    %17 = arith.select %11, %6, %16 : vector<8x16xi1>, vector<8x16xf32>
    %cst_7 = arith.constant dense<0.000000e+00> : vector<8xf32>
    %18 = vector.multi_reduction <add>, %17, %cst_7 [1] : vector<8x16xf32> to vector<8xf32>
    %19 = vector.shape_cast %18 : vector<8xf32> to vector<8x1xf32>
    %20 = math.log %8 : vector<8x1xf32>
    %21 = arith.subf %20, %15 : vector<8x1xf32>
    %22 = arith.divf %19, %8 : vector<8x1xf32>
    %cst_8 = arith.constant 1.000000e+00 : f32
    %23 = vector.broadcast %cst_8 : f32 to vector<8x1xf32>
    %24 = arith.subf %23, %22 : vector<8x1xf32>
    %cst_9 = arith.constant 2.500000e-01 : f32
    %25 = vector.broadcast %cst_9 : f32 to vector<8x1xf32>
    %26 = arith.mulf %25, %24 : vector<8x1xf32>
    %27 = arith.mulf %26, %24 : vector<8x1xf32>
    %28 = arith.mulf %27, %21 : vector<8x1xf32>
    %c8_i32 = arith.constant 8 : i32
    %29 = arith.muli %arg0, %c8_i32 : i32
    %30 = tpu.iota {dimensions = array<i32: 0>} : vector<8x1xi32>
    %31 = vector.broadcast %29 : i32 to vector<8x1xi32>
    %32 = arith.addi %31, %30 : vector<8x1xi32>
    %c8_i32_10 = arith.constant 8 : i32
    %33 = vector.broadcast %c8_i32_10 : i32 to vector<8x1xi32>
    %34 = arith.cmpi slt, %32, %33 : vector<8x1xi32>
    %cst_11 = arith.constant 0.000000e+00 : f32
    %35 = vector.broadcast %cst_11 : f32 to vector<8x1xf32>
    %36 = arith.select %34, %28, %35 : vector<8x1xi1>, vector<8x1xf32>
    %37 = vector.shape_cast %36 : vector<8x1xf32> to vector<1x8x1xf32>
    %cst_12 = arith.constant dense<0.000000e+00> : vector<1xf32>
    %38 = vector.multi_reduction <add>, %37, %cst_12 [1, 2] : vector<1x8x1xf32> to vector<1xf32>
    %39 = vector.shape_cast %38 : vector<1xf32> to vector<1x1x1xf32>
    %40 = vector.extract %39[0, 0, 0] : f32 from vector<1x1x1xf32>
    %41 = vector.broadcast %40 : f32 to vector<1x1x128xf32>
    %c0_13 = arith.constant 0 : index
    %c0_14 = arith.constant 0 : index
    %c0_15 = arith.constant 0 : index
    %42 = vector.load %arg3[%c0_13, %c0_14, %c0_15] : memref<1x1x128xf32, #tpu.memory_space<vmem>>, vector<1x1x128xf32>
    tpu.vector_store %arg3[%c0_13, %c0_14, %c0_15], %41 {strides = array<i32>} : memref<1x1x128xf32, #tpu.memory_space<vmem>>, vector<1x1x128xf32>,
    return
  }
  func.func @transform_0(%arg0: i32) -> (i32, i32) {
    %c0_i32 = arith.constant 0 : i32
    %c0_i32_0 = arith.constant 0 : i32
    return %arg0, %c0_i32 : i32, i32
  }
  func.func @transform_1(%arg0: i32) -> (i32, i32) {
    %c0_i32 = arith.constant 0 : i32
    %c0_i32_0 = arith.constant 0 : i32
    return %arg0, %c0_i32 : i32, i32
  }
  func.func @transform_2(%arg0: i32) -> (i32, i32, i32) {
    %c0_i32 = arith.constant 0 : i32
    %c0_i32_0 = arith.constant 0 : i32
    %c0_i32_1 = arith.constant 0 : i32
    return %arg0, %c0_i32, %c0_i32_0 : i32, i32, i32
  }
}

</mosaic_0001>

<bundles_post_ra>
// kernel: tpu_custom_call.1
= control target key start
LH: loop header
LB: loop body
LE: loop exit
PB: predicated region body
PF: predicated region fallthrough
CT: control target
= control target key end

     0   :  { %vm14_vm0 = vcmask 130048   ;;  %s144_s0 = inlined_call_operand.vmem [shape: f32[8,16], index: 0, kind: input, shape index: {}]   ;;  %s145_s1 = inlined_call_operand.vmem [shape: s32[8,1], index: 1, kind: input, shape index: {}]   ;;  %s146_s2 = inlined_call_operand.hbm [shape: f32[1,1,128], index: 2, kind: output, shape index: {}]  }
   0x1   :  { %v12_v0 = vld [vmem:[%s144_s0] sm:$0xff] }
   0x2   :  { %7 = vsyncpa [#allocation3], 0  ;;  %v15_v1 = vsel %vm14_vm0, %v12_v0, -inf  ;;  %v114_v2 = vmov 0   ;;  %v13_v3 = vld [vmem:[%s145_s1] sm:$0xff]  ;;  %v24_v7 = vlaneseq  ;;  %vm54_vm2 = vcmask 7168  }
   0x3   :  { %85 = vset.pattern.permute.xlu0 %v114_v2  ;;  %s115_s0 = smov [#allocation2]  }
   0x4   :  { %16 = vmax.xlane.f32.xlu0 %v15_v1  ;;  %v25_v8 = vand.u32 127, %v24_v7  ;;  %s73_s1 = sshll.u32 %s115_s0, 4  ;;  %s74_s1 = int_to_ptr.vmem [resolvable:$true] %s73_s1 }
   0x5   :  { %s92_s14 = scalar_lea.vmem %s74_s1, 16  ;;  %s96_s15 = scalar_lea.vmem %s74_s1, 32 }
   0x6   :  { %p93_p0 = scmp.ne.s32.totalorder %s74_s1, %s92_s14  ;;  %p97_p1 = scmp.lt.s32.totalorder %s74_s1, %s74_s1 }
   0x7   :  { %p98_p2 = scmp.lt.s32.totalorder %s96_s15, %s92_s14 }
   0x9   :  { %p99_p3 = por %p98_p2, %p97_p1 }
   0xb   :  { %p100_p4 = pnand %p99_p3, %p93_p0 }
  0x1a   :  { %27 = vperm.xlu0 %85, %v13_v3  }
  0x8d   :  { %v17_v4 = vpop.xlane.xlu0 %16 }
  0x8e   :  { %v18_v5 = vsub.f32 %v12_v0, %v17_v4 }
  0x90   :  { %v19_v6 = vmul.f32 1.442695, %v18_v5 }
  0x92   :  { %86 = vpow2.f32 %v19_v6 }
  0x95   :  { %v28_v9 = vpop.permute.xlu0 %27 }
  0x96   :  { %vm29_vm1 = vcmp.eq.s32.totalorder %v25_v8, %v28_v9 }
  0x97   :  { %v30_v14 = vsel %vm29_vm1, %v18_v5, 0.0 }
  0x98   :  { %v31_v15 = vsel %vm14_vm0, %v30_v14, 0.0 }
  0x9f   :  { %v87_v10 = vpop.eup %86 }
  0xa0   :  { %v21_v11 = vsel %vm14_vm0, %v87_v10, 0.0  ;;  %v34_v12 = vsel %vm29_vm1, %v87_v10, 0.0 }
  0xa1   :  { %22 = vadd.xlane.f32.xlu1 %v21_v11  ;;  %v35_v13 = vsel %vm14_vm0, %v34_v12, 0.0 }
  0xa5   :  { %36 = vadd.xlane.f32.xlu1 %v35_v13 }
  0xa9   :  { %32 = vadd.xlane.f32.xlu1 %v31_v15 }
 0x12a   :  { %v23_v16 = vpop.xlane.xlu1 %22 }
 0x12b   :  { %88 = vlog2.f32 %v23_v16 }
 0x12c   :  { %90 = vrcp.f32 %v23_v16 }
 0x12e   :  { %v37_v19 = vpop.xlane.xlu1 %36 }
 0x132   :  { %v33_v24 = vpop.xlane.xlu1 %32 }
 0x138   :  { %v89_v17 = vpop.eup %88 }
 0x139   :  { %v91_v18 = vpop.eup %90  ;;  %v39_v22 = vmul.f32 0.6931472, %v89_v17 }
 0x13a   :  { %v42_v20 = vmul.f32 %v91_v18, %v37_v19 }
 0x13b   :  { %v40_v26 = vsub.f32 %v39_v22, %v33_v24 }
 0x13c   :  { %v43_v21 = vsub.f32 1.0, %v42_v20 }
 0x13e   :  { %v44_v23 = vmul.f32 0.25, %v43_v21 }
 0x140   :  { %v45_v25 = vmul.f32 %v44_v23, %v43_v21 }
 0x142   :  { %v46_v27 = vmul.f32 %v45_v25, %v40_v26 }
 0x144   :  { %v55_v28 = vsel %vm54_vm2, %v46_v27, 0.0 }
 0x145   :  { %56 = vadd.xlane.f32.xlu1 %v55_v28 }
 0x1ce   :  { %v57_v29 = vpop.xlane.xlu1 %56 }
 0x1cf   :  { %v58_v30 = vrot.slane %v57_v29, 4 }
 0x1d1   :  { %v59_v31 = vadd.f32 %v58_v30, %v57_v29 }
 0x1d3   :  { %v60_v32 = vrot.slane %v59_v31, 2 }
 0x1d5   :  { %v61_v33 = vadd.f32 %v60_v32, %v59_v31 }
 0x1d7   :  { %v62_v34 = vrot.slane %v61_v33, 1 }
 0x1d9   :  { %v63_v35 = vadd.f32 %v62_v34, %v61_v33 }
 0x1db   :  { %81 = vpush %v63_v35 }
 0x20c   :  { %s82_s13 = spop %81 }
 0x20d   :  { %v65_v36 = vstv %s82_s13 }
 0x20e   :  { %66 = vst [vmem:[#allocation2] sm:$0x1] %v65_v36 }
 0x20f   :  { %103 = shalt.err (!%p100_p4)
}
 0x210   :  { %76 = dma.vmem_to_hbm [thread:$0]  %s74_s1, 16, %s146_s2, [#allocation3]  }
 0x211   :  { %112 = dma.done.wait [#allocation3], 16  }
 0x212   :  { %113 = vsyncadd [#allocation3], 4294967280 }
 0x213   :  { %80 = vsyncpa [#allocation3], 1 }

</bundles_post_ra>
